<compile_context>
chip_gen: v7x
topology: tpu7x:2x2x1
jax: 0.10.0
libtpu: 0.0.40
codegen_flags: <defaults>
</compile_context>

<pallas_src>
import functools

import jax
import jax.numpy as jnp
from jax.experimental import pallas as pl
from jax.experimental.pallas import tpu as pltpu


def _round_up(n, m):
    return ((n + m - 1) // m) * m


def _reslayer_kernel(x_ref, w1_ref, b1_ref, w2_ref, b2_ref, o_ref):
    # One batch tile (bb, Dp) resident in VMEM; full (Dp, Dp) weights resident.
    x = x_ref[...]                    # f32 (bb, Dp) — kept f32 for the residual
    b1 = b1_ref[...]                  # f32 (1, Dp)  — hoisted bias reads
    b2 = b2_ref[...]                  # f32 (1, Dp)

    # Linear 1 -> ReLU: bf16 operands on the MXU, f32 accumulation.
    y = jnp.dot(x.astype(jnp.bfloat16), w1_ref[...],
                preferred_element_type=jnp.float32)
    y = jnp.maximum(y + b1, 0.0)

    # TODO(synk): nn.Dropout(p=0.5) in training mode would need
    # pltpu.prng_seed + pltpu.prng_random_bits masking; eval mode is identity.

    # Linear 2 -> ReLU.
    y = jnp.dot(y.astype(jnp.bfloat16), w2_ref[...],
                preferred_element_type=jnp.float32)
    y = jnp.maximum(y + b2, 0.0)

    # Residual add in f32.
    o_ref[...] = (x + y).astype(o_ref.dtype)


@functools.partial(jax.jit, static_argnames=("block_b",))
def reslayer_forward(x, w1, b1, w2, b2, *, block_b=256):
    """x: (B, D) f32; w1, w2: (D, D) (in, out); b1, b2: (D,) or (1, D)."""
    assert block_b % 8 == 0, "block_b must be a multiple of the sublane count (8)"
    B, D = x.shape

    # Lane-dense feature dim (multiple of 128) and batch padded to a tile
    # multiple — avoids masked partial stores and divisibility asserts.
    Dp = _round_up(max(D, 128), 128)
    bb = block_b
    Bp = _round_up(B, bb)

    b1 = jnp.asarray(b1, jnp.float32).reshape(1, -1)
    b2 = jnp.asarray(b2, jnp.float32).reshape(1, -1)

    # Zero padding is exact: padded input features / weight rows & cols / bias
    # lanes contribute 0 through both matmuls, ReLUs and the residual, so
    # slicing the output back to (B, D) recovers the unpadded result.
    x_p = jnp.zeros((Bp, Dp), jnp.float32).at[:B, :D].set(x.astype(jnp.float32))
    w1_p = jnp.zeros((Dp, Dp), jnp.bfloat16).at[:D, :D].set(w1.astype(jnp.bfloat16))
    w2_p = jnp.zeros((Dp, Dp), jnp.bfloat16).at[:D, :D].set(w2.astype(jnp.bfloat16))
    b1_p = jnp.zeros((1, Dp), jnp.float32).at[:, :D].set(b1)
    b2_p = jnp.zeros((1, Dp), jnp.float32).at[:, :D].set(b2)

    grid = (Bp // bb,)

    # Advisory cost for XLA's scheduler: two (Bp, Dp) x (Dp, Dp) matmuls.
    cost = pl.CostEstimate(
        flops=4 * Bp * Dp * Dp,
        transcendentals=0,
        bytes_accessed=2 * Bp * Dp * 4 + 2 * Dp * Dp * 2 + 2 * Dp * 4,
    )

    # VMEM budget: bf16 weights (assume the pipeline keeps 2 buffers even with
    # constant index maps), double-buffered f32 x/out tiles, biases, headroom.
    # NOTE(v7x, 64 MiB VMEM): for very large D where this exceeds ~56 MiB,
    # split into two pallas_calls (one weight resident each) or tile K with an
    # accumulator instead of full-resident (Dp, Dp) weight blocks.
    vmem_bytes = (
        2 * (2 * Dp * Dp * 2)      # w1 + w2, bf16, x2 pipeline buffers
        + 2 * 2 * bb * Dp * 4      # x and out tiles, f32, double-buffered
        + 2 * 2 * Dp * 4           # biases
        + (4 << 20)                # headroom
    )
    vmem_bytes = max(16 * 1024 * 1024, min(vmem_bytes, 100 * 1024 * 1024))

    out_p = pl.pallas_call(
        _reslayer_kernel,
        out_shape=jax.ShapeDtypeStruct((Bp, Dp), jnp.float32),
        grid_spec=pltpu.PrefetchScalarGridSpec(
            num_scalar_prefetch=0,
            grid=grid,
            in_specs=[
                pl.BlockSpec((bb, Dp), lambda i: (i, 0)),   # x batch tile
                pl.BlockSpec((Dp, Dp), lambda i: (0, 0)),   # w1 (resident)
                pl.BlockSpec((1, Dp), lambda i: (0, 0)),    # b1 (resident)
                pl.BlockSpec((Dp, Dp), lambda i: (0, 0)),   # w2 (resident)
                pl.BlockSpec((1, Dp), lambda i: (0, 0)),    # b2 (resident)
            ],
            out_specs=pl.BlockSpec((bb, Dp), lambda i: (i, 0)),
        ),
        compiler_params=pltpu.CompilerParams(
            # Batch axis is embarrassingly parallel: with >=2 grid steps both
            # v7x TensorCores get work; harmless on v5e/v6e.
            dimension_semantics=("parallel",),
            vmem_limit_bytes=vmem_bytes,
        ),
        cost_estimate=cost,
        # Reuse the padded-x buffer as the output allocation (each grid step
        # reads its own tile before writing it back).
        input_output_aliases={0: 0},
    )(x_p, w1_p, b1_p, w2_p, b2_p)

    return out_p[:B, :D].astype(x.dtype)


def _reference(x, w1, b1, w2, b2):
    y = jnp.maximum(x @ w1 + b1, 0.0)
    y = jnp.maximum(y @ w2 + b2, 0.0)
    return x + y


if __name__ == "__main__":
    # Small shapes consistent with the module: batch=8, linear_size=32.
    B, D = 8, 32
    key = jax.random.PRNGKey(0)
    kx, kw1, kb1, kw2, kb2 = jax.random.split(key, 5)

    x = jax.random.normal(kx, (B, D), dtype=jnp.float32)
    # Deterministic init mimicking nn.Linear's uniform(-1/sqrt(D), 1/sqrt(D)).
    bound = 1.0 / jnp.sqrt(D)
    w1 = jax.random.uniform(kw1, (D, D), jnp.float32, -bound, bound)
    b1 = jax.random.uniform(kb1, (1, D), jnp.float32, -bound, bound)
    w2 = jax.random.uniform(kw2, (D, D), jnp.float32, -bound, bound)
    b2 = jax.random.uniform(kb2, (1, D), jnp.float32, -bound, bound)

    out = reslayer_forward(x, w1, b1, w2, b2)
    out = jax.block_until_ready(out)

    ref = _reference(x, w1, b1, w2, b2)
    assert out.shape == (B, D)
    # bf16 MXU operands with f32 accumulation -> loosened tolerance vs f32 ref.
    assert jnp.allclose(out, ref, atol=5e-2, rtol=5e-2), "mismatch vs reference"

    print("KERNEL_OK")
</pallas_src>

<mosaic_0001>
module attributes {stable_mosaic.version = 11 : i64} {
  func.func @_reslayer_kernel(%arg0: i32, %arg1: memref<256x128xf32, #tpu.memory_space<vmem>>, %arg2: memref<128x128xbf16, #tpu.memory_space<vmem>>, %arg3: memref<1x128xf32, #tpu.memory_space<vmem>>, %arg4: memref<128x128xbf16, #tpu.memory_space<vmem>>, %arg5: memref<1x128xf32, #tpu.memory_space<vmem>>, %arg6: memref<256x128xf32, #tpu.memory_space<vmem>>) attributes {dimension_semantics = [#tpu.dimension_semantics<parallel>], iteration_bounds = array<i64: 1>, scalar_prefetch = 0 : i64, scratch_operands = 0 : i64, tpu.core_type = #tpu.core_type<tc>, window_params = [{transform_indices = @transform_0, window_bounds = array<i64: 256, 128>}, {pipeline_mode = #tpu.pipeline_mode<synchronous>, transform_indices = @transform_1, window_bounds = array<i64: 128, 128>}, {pipeline_mode = #tpu.pipeline_mode<synchronous>, transform_indices = @transform_2, window_bounds = array<i64: 1, 128>}, {pipeline_mode = #tpu.pipeline_mode<synchronous>, transform_indices = @transform_3, window_bounds = array<i64: 128, 128>}, {pipeline_mode = #tpu.pipeline_mode<synchronous>, transform_indices = @transform_4, window_bounds = array<i64: 1, 128>}, {transform_indices = @transform_5, window_bounds = array<i64: 256, 128>}]} {
    %c0 = arith.constant 0 : index
    %c0_0 = arith.constant 0 : index
    %0 = vector.load %arg1[%c0, %c0_0] : memref<256x128xf32, #tpu.memory_space<vmem>>, vector<256x128xf32>
    %c0_1 = arith.constant 0 : index
    %c0_2 = arith.constant 0 : index
    %1 = vector.load %arg3[%c0_1, %c0_2] : memref<1x128xf32, #tpu.memory_space<vmem>>, vector<1x128xf32>
    %c0_3 = arith.constant 0 : index
    %c0_4 = arith.constant 0 : index
    %2 = vector.load %arg5[%c0_3, %c0_4] : memref<1x128xf32, #tpu.memory_space<vmem>>, vector<1x128xf32>
    %3 = arith.truncf %0 : vector<256x128xf32> to vector<256x128xbf16>
    %c0_5 = arith.constant 0 : index
    %c0_6 = arith.constant 0 : index
    %4 = vector.load %arg2[%c0_5, %c0_6] : memref<128x128xbf16, #tpu.memory_space<vmem>>, vector<128x128xbf16>
    %cst = arith.constant dense<0.000000e+00> : vector<256x128xf32>
    %5 = tpu.matmul %3, %4, %cst {dimension_numbers = #tpu.dot_dimension_numbers<[1], [0], [0], [1], [0, 0, 1, 1], [], []>} : vector<256x128xbf16>, vector<128x128xbf16>, vector<256x128xf32> -> vector<256x128xf32>
    %6 = vector.broadcast %1 : vector<1x128xf32> to vector<256x128xf32>
    %7 = arith.addf %5, %6 : vector<256x128xf32>
    %cst_7 = arith.constant 0.000000e+00 : f32
    %8 = vector.broadcast %cst_7 : f32 to vector<256x128xf32>
    %9 = arith.maximumf %7, %8 : vector<256x128xf32>
    %10 = arith.truncf %9 : vector<256x128xf32> to vector<256x128xbf16>
    %c0_8 = arith.constant 0 : index
    %c0_9 = arith.constant 0 : index
    %11 = vector.load %arg4[%c0_8, %c0_9] : memref<128x128xbf16, #tpu.memory_space<vmem>>, vector<128x128xbf16>
    %cst_10 = arith.constant dense<0.000000e+00> : vector<256x128xf32>
    %12 = tpu.matmul %10, %11, %cst_10 {dimension_numbers = #tpu.dot_dimension_numbers<[1], [0], [0], [1], [0, 0, 1, 1], [], []>} : vector<256x128xbf16>, vector<128x128xbf16>, vector<256x128xf32> -> vector<256x128xf32>
    %13 = vector.broadcast %2 : vector<1x128xf32> to vector<256x128xf32>
    %14 = arith.addf %12, %13 : vector<256x128xf32>
    %cst_11 = arith.constant 0.000000e+00 : f32
    %15 = vector.broadcast %cst_11 : f32 to vector<256x128xf32>
    %16 = arith.maximumf %14, %15 : vector<256x128xf32>
    %17 = arith.addf %0, %16 : vector<256x128xf32>
    %c0_12 = arith.constant 0 : index
    %c0_13 = arith.constant 0 : index
    %18 = vector.load %arg6[%c0_12, %c0_13] : memref<256x128xf32, #tpu.memory_space<vmem>>, vector<256x128xf32>
    tpu.vector_store %arg6[%c0_12, %c0_13], %17 {strides = array<i32>} : memref<256x128xf32, #tpu.memory_space<vmem>>, vector<256x128xf32>,
    return
  }
  func.func @transform_0(%arg0: i32) -> (i32, i32) {
    %c0_i32 = arith.constant 0 : i32
    %c0_i32_0 = arith.constant 0 : i32
    return %arg0, %c0_i32 : i32, i32
  }
  func.func @transform_1(%arg0: i32) -> (i32, i32) {
    %c0_i32 = arith.constant 0 : i32
    %c0_i32_0 = arith.constant 0 : i32
    %c0_i32_1 = arith.constant 0 : i32
    return %c0_i32, %c0_i32_0 : i32, i32
  }
  func.func @transform_2(%arg0: i32) -> (i32, i32) {
    %c0_i32 = arith.constant 0 : i32
    %c0_i32_0 = arith.constant 0 : i32
    %c0_i32_1 = arith.constant 0 : i32
    return %c0_i32, %c0_i32_0 : i32, i32
  }
  func.func @transform_3(%arg0: i32) -> (i32, i32) {
    %c0_i32 = arith.constant 0 : i32
    %c0_i32_0 = arith.constant 0 : i32
    %c0_i32_1 = arith.constant 0 : i32
    return %c0_i32, %c0_i32_0 : i32, i32
  }
  func.func @transform_4(%arg0: i32) -> (i32, i32) {
    %c0_i32 = arith.constant 0 : i32
    %c0_i32_0 = arith.constant 0 : i32
    %c0_i32_1 = arith.constant 0 : i32
    return %c0_i32, %c0_i32_0 : i32, i32
  }
  func.func @transform_5(%arg0: i32) -> (i32, i32) {
    %c0_i32 = arith.constant 0 : i32
    %c0_i32_0 = arith.constant 0 : i32
    return %arg0, %c0_i32 : i32, i32
  }
}

</mosaic_0001>

<bundles_post_ra>
// kernel: reslayer_forward.1
= control target key start
LH: loop header
LB: loop body
LE: loop exit
PB: predicated region body
PF: predicated region fallthrough
CT: control target
= control target key end

     0   :  { %s1331_s1 = inlined_call_operand.vmem [shape: bf16[128,128], index: 1, kind: input, shape index: {}]   ;;  %s1332_s0 = inlined_call_operand.vmem [shape: f32[256,128], index: 0, kind: input, shape index: {}, may-alias: {0,5}]   ;;  %s1333_s3 = inlined_call_operand.vmem [shape: bf16[128,128], index: 3, kind: input, shape index: {}]   ;;  %s1334_s2 = inlined_call_operand.vmem [shape: f32[1,128], index: 2, kind: input, shape index: {}]   ;;  %s1335_s4 = inlined_call_operand.vmem [shape: f32[1,128], index: 4, kind: input, shape index: {}]   ;;  %s1336_s5 = inlined_call_operand.vmem [shape: f32[256,128], index: 5, kind: output, shape index: {}, may-alias: {0,5}]  }
   0x1   :  { %v843_v0 = vld [vmem:[%s1331_s1] sm:$0xff]   ;;  %v844_v1 = vld [vmem:[%s1331_s1 + $0x8] sm:$0xff]   ;;  %v845_v2 = vld [vmem:[%s1331_s1 + $0x10] sm:$0xff]  }
   0x2   :  { %747 = vmatprep.subr.bf16.mxu0 %v843_v0  ;;  %v846_v3 = vld [vmem:[%s1331_s1 + $0x18] sm:$0xff]   ;;  %v904_v4 = vld [vmem:[%s1332_s0] sm:$0xff]  ;;  %v909_v5 = vld [vmem:[%s1332_s0 + $0x8] sm:$0xff] }
   0x3   :  { %748 = vmatpush3.bf16.msra.mxu0 %v843_v0  ;;  %v55_v6 = vpack.c.bf16 %v909_v5, %v904_v4  ;;  %v847_v7 = vld [vmem:[%s1331_s1 + $0x20] sm:$0xff]   ;;  %v848_v8 = vld [vmem:[%s1331_s1 + $0x28] sm:$0xff]   ;;  %v849_v9 = vld [vmem:[%s1331_s1 + $0x30] sm:$0xff]  }
   0x4   :  { %749 = vmatprep.subr.bf16.mxu0 %v844_v1  ;;  %v851_v10 = vld [vmem:[%s1333_s3] sm:$0xff]   ;;  %v852_v11 = vld [vmem:[%s1333_s3 + $0x8] sm:$0xff]   ;;  %v853_v12 = vld [vmem:[%s1333_s3 + $0x10] sm:$0xff]  }
   0x5   :  { %763 = vmatprep.mubr.bf16.mxu0 %v55_v6  ;;  %795 = vmatprep.subr.bf16.mxu1 %v851_v10  ;;  %v850_v13 = vld [vmem:[%s1331_s1 + $0x38] sm:$0xff]   ;;  %v937_v14 = vld [vmem:[%s1332_s0 + $0x10] sm:$0xff]  ;;  %v950_v17 = vld [vmem:[%s1332_s0 + $0x20] sm:$0xff] }
   0x6   :  { %796 = vmatpush3.bf16.msra.mxu1 %v851_v10  ;;  %v942_v15 = vld [vmem:[%s1332_s0 + $0x18] sm:$0xff]  ;;  %v955_v18 = vld [vmem:[%s1332_s0 + $0x28] sm:$0xff]  ;;  %v855_v21 = vld [vmem:[%s1333_s3 + $0x20] sm:$0xff]  }
   0x7   :  { %750 = vmatpush3.bf16.msra.mxu0 %v844_v1  ;;  %797 = vmatprep.subr.bf16.mxu1 %v852_v11  ;;  %v854_v16 = vld [vmem:[%s1333_s3 + $0x18] sm:$0xff]   ;;  %v56_v19 = vpack.c.bf16 %v942_v15, %v937_v14  ;;  %v57_v20 = vpack.c.bf16 %v955_v18, %v950_v17  ;;  %v967_v22 = vld [vmem:[%s1332_s0 + $0x30] sm:$0xff]  ;;  %v856_v24 = vld [vmem:[%s1333_s3 + $0x28] sm:$0xff]  }
   0x8   :  { %751 = vmatprep.subr.bf16.mxu0 %v845_v2  ;;  %v972_v23 = vld [vmem:[%s1332_s0 + $0x38] sm:$0xff]  ;;  %v980_v25 = vld [vmem:[%s1332_s0 + $0x40] sm:$0xff]  ;;  %v985_v26 = vld [vmem:[%s1332_s0 + $0x48] sm:$0xff] }
   0x9   :  { %v58_v27 = vpack.c.bf16 %v972_v23, %v967_v22  ;;  %v59_v28 = vpack.c.bf16 %v985_v26, %v980_v25  ;;  %v994_v29 = vld [vmem:[%s1332_s0 + $0x50] sm:$0xff]  ;;  %v999_v30 = vld [vmem:[%s1332_s0 + $0x58] sm:$0xff]  ;;  %v1004_v31 = vld [vmem:[%s1332_s0 + $0x60] sm:$0xff] }
   0xa   :  { %798 = vmatpush3.bf16.msra.mxu1 %v852_v11  ;;  %v1009_v32 = vld [vmem:[%s1332_s0 + $0x68] sm:$0xff]  ;;  %v60_v33 = vpack.c.bf16 %v999_v30, %v994_v29  ;;  %v1018_v35 = vld [vmem:[%s1332_s0 + $0x70] sm:$0xff]  ;;  %v1023_v36 = vld [vmem:[%s1332_s0 + $0x78] sm:$0xff] }
   0xb   :  { %752 = vmatpush3.bf16.msra.mxu0 %v845_v2  ;;  %799 = vmatprep.subr.bf16.mxu1 %v853_v12  ;;  %v61_v34 = vpack.c.bf16 %v1009_v32, %v1004_v31  ;;  %v1028_v37 = vld [vmem:[%s1332_s0 + $0x80] sm:$0xff]  ;;  %v1033_v38 = vld [vmem:[%s1332_s0 + $0x88] sm:$0xff]  ;;  %v62_v39 = vpack.c.bf16 %v1023_v36, %v1018_v35  ;;  %v1042_v41 = vld [vmem:[%s1332_s0 + $0x90] sm:$0xff] }
   0xc   :  { %753 = vmatprep.subr.bf16.mxu0 %v846_v3  ;;  %v63_v40 = vpack.c.bf16 %v1033_v38, %v1028_v37  ;;  %v1047_v42 = vld [vmem:[%s1332_s0 + $0x98] sm:$0xff]  ;;  %v1052_v43 = vld [vmem:[%s1332_s0 + $0xa0] sm:$0xff]  ;;  %v1057_v44 = vld [vmem:[%s1332_s0 + $0xa8] sm:$0xff] }
   0xd   :  { %v64_v45 = vpack.c.bf16 %v1047_v42, %v1042_v41  ;;  %v65_v46 = vpack.c.bf16 %v1057_v44, %v1052_v43  ;;  %v1066_v47 = vld [vmem:[%s1332_s0 + $0xb0] sm:$0xff]  ;;  %v1071_v48 = vld [vmem:[%s1332_s0 + $0xb8] sm:$0xff]  ;;  %v1076_v49 = vld [vmem:[%s1332_s0 + $0xc0] sm:$0xff] }
   0xe   :  { %800 = vmatpush3.bf16.msra.mxu1 %v853_v12  ;;  %v1081_v50 = vld [vmem:[%s1332_s0 + $0xc8] sm:$0xff]  ;;  %v66_v51 = vpack.c.bf16 %v1071_v48, %v1066_v47  ;;  %v1090_v53 = vld [vmem:[%s1332_s0 + $0xd0] sm:$0xff]  ;;  %v1095_v54 = vld [vmem:[%s1332_s0 + $0xd8] sm:$0xff] }
   0xf   :  { %754 = vmatpush3.bf16.msra.mxu0 %v846_v3  ;;  %801 = vmatprep.subr.bf16.mxu1 %v854_v16  ;;  %v67_v52 = vpack.c.bf16 %v1081_v50, %v1076_v49  ;;  %v1100_v55 = vld [vmem:[%s1332_s0 + $0xe0] sm:$0xff]  ;;  %v1105_v56 = vld [vmem:[%s1332_s0 + $0xe8] sm:$0xff]  ;;  %v68_v57 = vpack.c.bf16 %v1095_v54, %v1090_v53  ;;  %v1114_v59 = vld [vmem:[%s1332_s0 + $0xf0] sm:$0xff] }
  0x10   :  { %755 = vmatprep.subr.bf16.mxu0 %v847_v7  ;;  %v69_v58 = vpack.c.bf16 %v1105_v56, %v1100_v55  ;;  %v1119_v60 = vld [vmem:[%s1332_s0 + $0xf8] sm:$0xff]  ;;  %v857_v62 = vld [vmem:[%s1333_s3 + $0x30] sm:$0xff]   ;;  %v1132_v0 = vld [vmem:[%s1334_s2] ss:$0 sm:$0xff] }
  0x11   :  { %v70_v61 = vpack.c.bf16 %v1119_v60, %v1114_v59  ;;  %v858_v63 = vld [vmem:[%s1333_s3 + $0x38] sm:$0xff]  }
  0x12   :  { %802 = vmatpush3.bf16.msra.mxu1 %v854_v16 }
  0x13   :  { %756 = vmatpush3.bf16.msra.mxu0 %v847_v7  ;;  %803 = vmatprep.subr.bf16.mxu1 %v855_v21 }
  0x14   :  { %757 = vmatprep.subr.bf16.mxu0 %v848_v8 }
  0x16   :  { %804 = vmatpush3.bf16.msra.mxu1 %v855_v21 }
  0x17   :  { %758 = vmatpush3.bf16.msra.mxu0 %v848_v8  ;;  %805 = vmatprep.subr.bf16.mxu1 %v856_v24 }
  0x18   :  { %759 = vmatprep.subr.bf16.mxu0 %v849_v9 }
  0x1a   :  { %806 = vmatpush3.bf16.msra.mxu1 %v856_v24 }
  0x1b   :  { %760 = vmatpush3.bf16.msra.mxu0 %v849_v9  ;;  %807 = vmatprep.subr.bf16.mxu1 %v857_v62 }
  0x1c   :  { %761 = vmatprep.subr.bf16.mxu0 %v850_v13 }
  0x1e   :  { %808 = vmatpush3.bf16.msra.mxu1 %v857_v62 }
  0x1f   :  { %762 = vmatpush3.bf16.msra.mxu0 %v850_v13  ;;  %809 = vmatprep.subr.bf16.mxu1 %v858_v63 }
  0x22   :  { %764 = vmatmul.mubr.bf16.vlgmr.msra.gmra.mrb[0].mxu0 %v56_v19  ;;  %810 = vmatpush3.bf16.msra.mxu1 %v858_v63 }
  0x23   :  { %767 = vmatprep.mubr.bf16.mxu0 %v57_v20 }
  0x2a   :  { %768 = vmatmul.mubr.bf16.gmra.mrb[4].mxu0 %v58_v27 }
  0x2b   :  { %771 = vmatprep.mubr.bf16.mxu0 %v59_v28 }
  0x32   :  { %772 = vmatmul.mubr.bf16.gmra.mrb[8].mxu0 %v60_v33 }
  0x33   :  { %775 = vmatprep.mubr.bf16.mxu0 %v61_v34 }
  0x3a   :  { %776 = vmatmul.mubr.bf16.gmra.mrb[12].mxu0 %v62_v39 }
  0x3b   :  { %779 = vmatprep.mubr.bf16.mxu0 %v63_v40 }
  0x42   :  { %780 = vmatmul.mubr.bf16.gmra.mrb[16].mxu0 %v64_v45 }
  0x43   :  { %783 = vmatprep.mubr.bf16.mxu0 %v65_v46 }
  0x4a   :  { %784 = vmatmul.mubr.bf16.gmra.mrb[20].mxu0 %v66_v51 }
  0x4b   :  { %787 = vmatprep.mubr.bf16.mxu0 %v67_v52 }
  0x52   :  { %788 = vmatmul.mubr.bf16.gmra.mrb[24].mxu0 %v68_v57 }
  0x53   :  { %791 = vmatprep.mubr.bf16.mxu0 %v69_v58 }
  0x5a   :  { %792 = vmatmul.mubr.bf16.gmra.mrb[28].mxu0 %v70_v61 }
  0xf5   :  { %v765_v1 = vpop.f32.mrb[0].mxu0 }
  0xf6   :  { %v184_v2 = vadd.f32 %v765_v1, %v1132_v0  ;;  %v175_v3 = vpop.f32.mrb[1].mxu0 }
  0xf7   :  { %v176_v6 = vadd.f32 %v1132_v0, %v175_v3  ;;  %v766_v7 = vpop.f32.mrb[2].mxu0 }
  0xf8   :  { %v187_v8 = vadd.f32 %v766_v7, %v1132_v0  ;;  %v178_v9 = vpop.f32.mrb[3].mxu0  ;;  %v304_v11 = vmax.f32 %v184_v2, 0.0 }
  0xf9   :  { %v179_v10 = vadd.f32 %v1132_v0, %v178_v9  ;;  %v302_v13 = vmax.f32 %v176_v6, 0.0 }
  0xfa   :  { %v305_v12 = vmax.f32 %v187_v8, 0.0 }
  0xfb   :  { %v303_v16 = vmax.f32 %v179_v10, 0.0 }
  0xfc   :  { %v335_v19 = vpack.c.bf16 %v305_v12, %v304_v11 }
  0xfd   :  { %v769_v20 = vpop.f32.mrb[4].mxu0  ;;  %v334_v21 = vpack.c.bf16 %v303_v16, %v302_v13 }
  0xfe   :  { %v200_v24 = vadd.f32 %v769_v20, %v1132_v0  ;;  %v191_v27 = vpop.f32.mrb[5].mxu0 }
  0xff   :  { %v192_v28 = vadd.f32 %v1132_v0, %v191_v27  ;;  %v770_v33 = vpop.f32.mrb[6].mxu0  ;;  %811 = vmatprep.mubr.bf16.mxu1 %v334_v21 }
 0x100   :  { %v203_v34 = vadd.f32 %v770_v33, %v1132_v0  ;;  %v194_v39 = vpop.f32.mrb[7].mxu0  ;;  %812 = vmatmul.mubr.bf16.vlgmr.msra.gmra.mrb[0].mxu1 %v335_v19  ;;  %v308_v45 = vmax.f32 %v200_v24, 0.0 }
 0x101   :  { %v195_v40 = vadd.f32 %v1132_v0, %v194_v39  ;;  %v306_v51 = vmax.f32 %v192_v28, 0.0 }
 0x102   :  { %v309_v46 = vmax.f32 %v203_v34, 0.0 }
 0x103   :  { %v307_v52 = vmax.f32 %v195_v40, 0.0 }
 0x104   :  { %v337_v57 = vpack.c.bf16 %v309_v46, %v308_v45 }
 0x105   :  { %v336_v58 = vpack.c.bf16 %v307_v52, %v306_v51  ;;  %v773_v61 = vpop.f32.mrb[8].mxu0 }
 0x106   :  { %v216_v62 = vadd.f32 %v773_v61, %v1132_v0  ;;  %v207_v63 = vpop.f32.mrb[9].mxu0 }
 0x107   :  { %v208_v1 = vadd.f32 %v1132_v0, %v207_v63  ;;  %v774_v2 = vpop.f32.mrb[10].mxu0  ;;  %815 = vmatprep.mubr.bf16.mxu1 %v336_v58 }
 0x108   :  { %v219_v3 = vadd.f32 %v774_v2, %v1132_v0  ;;  %v210_v6 = vpop.f32.mrb[11].mxu0  ;;  %816 = vmatmul.mubr.bf16.gmra.mrb[4].mxu1 %v337_v57  ;;  %v312_v8 = vmax.f32 %v216_v62, 0.0 }
 0x109   :  { %v211_v7 = vadd.f32 %v1132_v0, %v210_v6  ;;  %v310_v10 = vmax.f32 %v208_v1, 0.0 }
 0x10a   :  { %v313_v9 = vmax.f32 %v219_v3, 0.0 }
 0x10b   :  { %v311_v11 = vmax.f32 %v211_v7, 0.0 }
 0x10c   :  { %v339_v12 = vpack.c.bf16 %v313_v9, %v312_v8 }
 0x10d   :  { %v338_v13 = vpack.c.bf16 %v311_v11, %v310_v10  ;;  %v777_v16 = vpop.f32.mrb[12].mxu0 }
 0x10e   :  { %v232_v19 = vadd.f32 %v777_v16, %v1132_v0  ;;  %v223_v20 = vpop.f32.mrb[13].mxu0 }
 0x10f   :  { %v224_v21 = vadd.f32 %v1132_v0, %v223_v20  ;;  %v778_v24 = vpop.f32.mrb[14].mxu0  ;;  %819 = vmatprep.mubr.bf16.mxu1 %v338_v13 }
 0x110   :  { %v235_v27 = vadd.f32 %v778_v24, %v1132_v0  ;;  %v226_v28 = vpop.f32.mrb[15].mxu0  ;;  %820 = vmatmul.mubr.bf16.gmra.mrb[8].mxu1 %v339_v12  ;;  %v316_v34 = vmax.f32 %v232_v19, 0.0 }
 0x111   :  { %v227_v33 = vadd.f32 %v1132_v0, %v226_v28  ;;  %v314_v40 = vmax.f32 %v224_v21, 0.0 }
 0x112   :  { %v317_v39 = vmax.f32 %v235_v27, 0.0 }
 0x113   :  { %v315_v45 = vmax.f32 %v227_v33, 0.0 }
 0x114   :  { %v341_v46 = vpack.c.bf16 %v317_v39, %v316_v34 }
 0x115   :  { %v340_v51 = vpack.c.bf16 %v315_v45, %v314_v40  ;;  %v781_v52 = vpop.f32.mrb[16].mxu0 }
 0x116   :  { %v248_v57 = vadd.f32 %v781_v52, %v1132_v0  ;;  %v239_v58 = vpop.f32.mrb[17].mxu0 }
 0x117   :  { %v240_v61 = vadd.f32 %v1132_v0, %v239_v58  ;;  %v782_v62 = vpop.f32.mrb[18].mxu0  ;;  %823 = vmatprep.mubr.bf16.mxu1 %v340_v51 }
 0x118   :  { %v251_v63 = vadd.f32 %v782_v62, %v1132_v0  ;;  %v242_v1 = vpop.f32.mrb[19].mxu0  ;;  %824 = vmatmul.mubr.bf16.gmra.mrb[12].mxu1 %v341_v46  ;;  %v320_v3 = vmax.f32 %v248_v57, 0.0 }
 0x119   :  { %v243_v2 = vadd.f32 %v1132_v0, %v242_v1  ;;  %v318_v7 = vmax.f32 %v240_v61, 0.0 }
 0x11a   :  { %v321_v6 = vmax.f32 %v251_v63, 0.0 }
 0x11b   :  { %v319_v8 = vmax.f32 %v243_v2, 0.0 }
 0x11c   :  { %v343_v9 = vpack.c.bf16 %v321_v6, %v320_v3 }
 0x11d   :  { %v342_v10 = vpack.c.bf16 %v319_v8, %v318_v7  ;;  %v785_v11 = vpop.f32.mrb[20].mxu0 }
 0x11e   :  { %v264_v12 = vadd.f32 %v785_v11, %v1132_v0  ;;  %v255_v13 = vpop.f32.mrb[21].mxu0 }
 0x11f   :  { %v256_v16 = vadd.f32 %v1132_v0, %v255_v13  ;;  %v786_v19 = vpop.f32.mrb[22].mxu0  ;;  %827 = vmatprep.mubr.bf16.mxu1 %v342_v10 }
 0x120   :  { %v267_v20 = vadd.f32 %v786_v19, %v1132_v0  ;;  %v258_v21 = vpop.f32.mrb[23].mxu0  ;;  %828 = vmatmul.mubr.bf16.gmra.mrb[16].mxu1 %v343_v9  ;;  %v324_v27 = vmax.f32 %v264_v12, 0.0 }
 0x121   :  { %v259_v24 = vadd.f32 %v1132_v0, %v258_v21  ;;  %v322_v33 = vmax.f32 %v256_v16, 0.0 }
 0x122   :  { %v325_v28 = vmax.f32 %v267_v20, 0.0 }
 0x123   :  { %v323_v34 = vmax.f32 %v259_v24, 0.0 }
 0x124   :  { %v345_v39 = vpack.c.bf16 %v325_v28, %v324_v27 }
 0x125   :  { %v344_v40 = vpack.c.bf16 %v323_v34, %v322_v33  ;;  %v789_v45 = vpop.f32.mrb[24].mxu0  ;;  %v1169_v34 = vld [vmem:[%s1335_s4] ss:$0 sm:$0xff] }
 0x126   :  { %v280_v46 = vadd.f32 %v789_v45, %v1132_v0  ;;  %v271_v51 = vpop.f32.mrb[25].mxu0 }
 0x127   :  { %v272_v52 = vadd.f32 %v1132_v0, %v271_v51  ;;  %v790_v57 = vpop.f32.mrb[26].mxu0  ;;  %831 = vmatprep.mubr.bf16.mxu1 %v344_v40 }
 0x128   :  { %v283_v58 = vadd.f32 %v790_v57, %v1132_v0  ;;  %v274_v61 = vpop.f32.mrb[27].mxu0  ;;  %832 = vmatmul.mubr.bf16.gmra.mrb[20].mxu1 %v345_v39  ;;  %v328_v63 = vmax.f32 %v280_v46, 0.0 }
 0x129   :  { %v275_v62 = vadd.f32 %v1132_v0, %v274_v61  ;;  %v326_v2 = vmax.f32 %v272_v52, 0.0 }
 0x12a   :  { %v329_v1 = vmax.f32 %v283_v58, 0.0 }
 0x12b   :  { %v327_v3 = vmax.f32 %v275_v62, 0.0 }
 0x12c   :  { %v347_v6 = vpack.c.bf16 %v329_v1, %v328_v63 }
 0x12d   :  { %v346_v7 = vpack.c.bf16 %v327_v3, %v326_v2  ;;  %v793_v8 = vpop.f32.mrb[28].mxu0 }
 0x12e   :  { %v296_v9 = vadd.f32 %v793_v8, %v1132_v0  ;;  %v287_v10 = vpop.f32.mrb[29].mxu0 }
 0x12f   :  { %v288_v11 = vadd.f32 %v1132_v0, %v287_v10  ;;  %v794_v12 = vpop.f32.mrb[30].mxu0  ;;  %835 = vmatprep.mubr.bf16.mxu1 %v346_v7 }
 0x130   :  { %v299_v13 = vadd.f32 %v794_v12, %v1132_v0  ;;  %v290_v16 = vpop.f32.mrb[31].mxu0  ;;  %836 = vmatmul.mubr.bf16.gmra.mrb[24].mxu1 %v347_v6  ;;  %v332_v20 = vmax.f32 %v296_v9, 0.0 }
 0x131   :  { %v291_v19 = vadd.f32 %v1132_v0, %v290_v16  ;;  %v330_v24 = vmax.f32 %v288_v11, 0.0 }
 0x132   :  { %v333_v21 = vmax.f32 %v299_v13, 0.0 }
 0x133   :  { %v331_v27 = vmax.f32 %v291_v19, 0.0 }
 0x134   :  { %v349_v28 = vpack.c.bf16 %v333_v21, %v332_v20 }
 0x135   :  { %v348_v33 = vpack.c.bf16 %v331_v27, %v330_v24 }
 0x137   :  { %839 = vmatprep.mubr.bf16.mxu1 %v348_v33 }
 0x138   :  { %840 = vmatmul.mubr.bf16.gmra.mrb[28].mxu1 %v349_v28 }
 0x1d3   :  { %v813_v39 = vpop.f32.mrb[0].mxu1 }
 0x1d4   :  { %v463_v40 = vadd.f32 %v813_v39, %v1169_v34  ;;  %v454_v45 = vpop.f32.mrb[1].mxu1 }
 0x1d5   :  { %v455_v46 = vadd.f32 %v1169_v34, %v454_v45  ;;  %v814_v0 = vpop.f32.mrb[2].mxu1 }
 0x1d6   :  { %v583_v51 = vmax.f32 %v463_v40, 0.0  ;;  %v466_v52 = vadd.f32 %v814_v0, %v1169_v34  ;;  %v457_v57 = vpop.f32.mrb[3].mxu1 }
 0x1d7   :  { %v581_v58 = vmax.f32 %v455_v46, 0.0  ;;  %v458_v61 = vadd.f32 %v1169_v34, %v457_v57 }
 0x1d8   :  { %v615_v62 = vadd.f32 %v583_v51, %v937_v14  ;;  %v584_v63 = vmax.f32 %v466_v52, 0.0 }
 0x1d9   :  { %v613_v1 = vadd.f32 %v581_v58, %v904_v4  ;;  %v582_v2 = vmax.f32 %v458_v61, 0.0 }
 0x1da   :  { %647 = vst [vmem:[%s1336_s5 + $0x10] sm:$0xff] %v615_v62  ;;  %v616_v3 = vadd.f32 %v584_v63, %v942_v15 }
 0x1db   :  { %645 = vst [vmem:[%s1336_s5] sm:$0xff] %v613_v1  ;;  %v614_v6 = vadd.f32 %v582_v2, %v909_v5  ;;  %v817_v7 = vpop.f32.mrb[4].mxu1 }
 0x1dc   :  { %648 = vst [vmem:[%s1336_s5 + $0x18] sm:$0xff] %v616_v3  ;;  %v479_v4 = vadd.f32 %v817_v7, %v1169_v34  ;;  %v470_v14 = vpop.f32.mrb[5].mxu1 }
 0x1dd   :  { %646 = vst [vmem:[%s1336_s5 + $0x8] sm:$0xff] %v614_v6  ;;  %v471_v15 = vadd.f32 %v1169_v34, %v470_v14  ;;  %v818_v8 = vpop.f32.mrb[6].mxu1 }
 0x1de   :  { %v587_v9 = vmax.f32 %v479_v4, 0.0  ;;  %v482_v10 = vadd.f32 %v818_v8, %v1169_v34  ;;  %v473_v11 = vpop.f32.mrb[7].mxu1 }
 0x1df   :  { %v585_v5 = vmax.f32 %v471_v15, 0.0  ;;  %v474_v12 = vadd.f32 %v1169_v34, %v473_v11 }
 0x1e0   :  { %v619_v13 = vadd.f32 %v587_v9, %v967_v22  ;;  %v588_v16 = vmax.f32 %v482_v10, 0.0 }
 0x1e1   :  { %v617_v19 = vadd.f32 %v585_v5, %v950_v17  ;;  %v586_v20 = vmax.f32 %v474_v12, 0.0 }
 0x1e2   :  { %651 = vst [vmem:[%s1336_s5 + $0x30] sm:$0xff] %v619_v13  ;;  %v620_v21 = vadd.f32 %v588_v16, %v972_v23 }
 0x1e3   :  { %649 = vst [vmem:[%s1336_s5 + $0x20] sm:$0xff] %v617_v19  ;;  %v618_v24 = vadd.f32 %v586_v20, %v955_v18  ;;  %v821_v27 = vpop.f32.mrb[8].mxu1 }
 0x1e4   :  { %652 = vst [vmem:[%s1336_s5 + $0x38] sm:$0xff] %v620_v21  ;;  %v495_v17 = vadd.f32 %v821_v27, %v1169_v34  ;;  %v486_v22 = vpop.f32.mrb[9].mxu1 }
 0x1e5   :  { %650 = vst [vmem:[%s1336_s5 + $0x28] sm:$0xff] %v618_v24  ;;  %v487_v23 = vadd.f32 %v1169_v34, %v486_v22  ;;  %v822_v28 = vpop.f32.mrb[10].mxu1 }
 0x1e6   :  { %v591_v33 = vmax.f32 %v495_v17, 0.0  ;;  %v498_v39 = vadd.f32 %v822_v28, %v1169_v34  ;;  %v489_v40 = vpop.f32.mrb[11].mxu1 }
 0x1e7   :  { %v589_v18 = vmax.f32 %v487_v23, 0.0  ;;  %v490_v45 = vadd.f32 %v1169_v34, %v489_v40 }
 0x1e8   :  { %v623_v46 = vadd.f32 %v591_v33, %v994_v29  ;;  %v592_v0 = vmax.f32 %v498_v39, 0.0 }
 0x1e9   :  { %v621_v51 = vadd.f32 %v589_v18, %v980_v25  ;;  %v590_v52 = vmax.f32 %v490_v45, 0.0 }
 0x1ea   :  { %655 = vst [vmem:[%s1336_s5 + $0x50] sm:$0xff] %v623_v46  ;;  %v624_v57 = vadd.f32 %v592_v0, %v999_v30 }
 0x1eb   :  { %653 = vst [vmem:[%s1336_s5 + $0x40] sm:$0xff] %v621_v51  ;;  %v622_v58 = vadd.f32 %v590_v52, %v985_v26  ;;  %v825_v61 = vpop.f32.mrb[12].mxu1 }
 0x1ec   :  { %656 = vst [vmem:[%s1336_s5 + $0x58] sm:$0xff] %v624_v57  ;;  %v511_v25 = vadd.f32 %v825_v61, %v1169_v34  ;;  %v502_v29 = vpop.f32.mrb[13].mxu1 }
 0x1ed   :  { %654 = vst [vmem:[%s1336_s5 + $0x48] sm:$0xff] %v622_v58  ;;  %v503_v30 = vadd.f32 %v1169_v34, %v502_v29  ;;  %v826_v62 = vpop.f32.mrb[14].mxu1 }
 0x1ee   :  { %v595_v63 = vmax.f32 %v511_v25, 0.0  ;;  %v514_v1 = vadd.f32 %v826_v62, %v1169_v34  ;;  %v505_v2 = vpop.f32.mrb[15].mxu1 }
 0x1ef   :  { %v593_v26 = vmax.f32 %v503_v30, 0.0  ;;  %v506_v3 = vadd.f32 %v1169_v34, %v505_v2 }
 0x1f0   :  { %v627_v6 = vadd.f32 %v595_v63, %v1018_v35  ;;  %v596_v7 = vmax.f32 %v514_v1, 0.0 }
 0x1f1   :  { %v625_v4 = vadd.f32 %v593_v26, %v1004_v31  ;;  %v594_v14 = vmax.f32 %v506_v3, 0.0 }
 0x1f2   :  { %659 = vst [vmem:[%s1336_s5 + $0x70] sm:$0xff] %v627_v6  ;;  %v628_v15 = vadd.f32 %v596_v7, %v1023_v36 }
 0x1f3   :  { %657 = vst [vmem:[%s1336_s5 + $0x60] sm:$0xff] %v625_v4  ;;  %v626_v8 = vadd.f32 %v594_v14, %v1009_v32  ;;  %v829_v9 = vpop.f32.mrb[16].mxu1 }
 0x1f4   :  { %660 = vst [vmem:[%s1336_s5 + $0x78] sm:$0xff] %v628_v15  ;;  %v527_v31 = vadd.f32 %v829_v9, %v1169_v34  ;;  %v518_v35 = vpop.f32.mrb[17].mxu1 }
 0x1f5   :  { %658 = vst [vmem:[%s1336_s5 + $0x68] sm:$0xff] %v626_v8  ;;  %v519_v36 = vadd.f32 %v1169_v34, %v518_v35  ;;  %v830_v10 = vpop.f32.mrb[18].mxu1 }
 0x1f6   :  { %v599_v11 = vmax.f32 %v527_v31, 0.0  ;;  %v530_v5 = vadd.f32 %v830_v10, %v1169_v34  ;;  %v521_v12 = vpop.f32.mrb[19].mxu1 }
 0x1f7   :  { %v597_v32 = vmax.f32 %v519_v36, 0.0  ;;  %v522_v13 = vadd.f32 %v1169_v34, %v521_v12 }
 0x1f8   :  { %v631_v16 = vadd.f32 %v599_v11, %v1042_v41  ;;  %v600_v19 = vmax.f32 %v530_v5, 0.0 }
 0x1f9   :  { %v629_v20 = vadd.f32 %v597_v32, %v1028_v37  ;;  %v598_v21 = vmax.f32 %v522_v13, 0.0 }
 0x1fa   :  { %663 = vst [vmem:[%s1336_s5 + $0x90] sm:$0xff] %v631_v16  ;;  %v632_v24 = vadd.f32 %v600_v19, %v1047_v42 }
 0x1fb   :  { %661 = vst [vmem:[%s1336_s5 + $0x80] sm:$0xff] %v629_v20  ;;  %v630_v27 = vadd.f32 %v598_v21, %v1033_v38  ;;  %v833_v17 = vpop.f32.mrb[20].mxu1 }
 0x1fc   :  { %664 = vst [vmem:[%s1336_s5 + $0x98] sm:$0xff] %v632_v24  ;;  %v543_v37 = vadd.f32 %v833_v17, %v1169_v34  ;;  %v534_v41 = vpop.f32.mrb[21].mxu1 }
 0x1fd   :  { %662 = vst [vmem:[%s1336_s5 + $0x88] sm:$0xff] %v630_v27  ;;  %v535_v42 = vadd.f32 %v1169_v34, %v534_v41  ;;  %v834_v22 = vpop.f32.mrb[22].mxu1 }
 0x1fe   :  { %v603_v23 = vmax.f32 %v543_v37, 0.0  ;;  %v546_v28 = vadd.f32 %v834_v22, %v1169_v34  ;;  %v537_v33 = vpop.f32.mrb[23].mxu1 }
 0x1ff   :  { %v601_v38 = vmax.f32 %v535_v42, 0.0  ;;  %v538_v39 = vadd.f32 %v1169_v34, %v537_v33 }
 0x200   :  { %v635_v40 = vadd.f32 %v603_v23, %v1066_v47  ;;  %v604_v18 = vmax.f32 %v546_v28, 0.0 }
 0x201   :  { %v633_v45 = vadd.f32 %v601_v38, %v1052_v43  ;;  %v602_v46 = vmax.f32 %v538_v39, 0.0 }
 0x202   :  { %667 = vst [vmem:[%s1336_s5 + $0xb0] sm:$0xff] %v635_v40  ;;  %v636_v0 = vadd.f32 %v604_v18, %v1071_v48 }
 0x203   :  { %665 = vst [vmem:[%s1336_s5 + $0xa0] sm:$0xff] %v633_v45  ;;  %v634_v51 = vadd.f32 %v602_v46, %v1057_v44  ;;  %v837_v52 = vpop.f32.mrb[24].mxu1 }
 0x204   :  { %668 = vst [vmem:[%s1336_s5 + $0xb8] sm:$0xff] %v636_v0  ;;  %v559_v43 = vadd.f32 %v837_v52, %v1169_v34  ;;  %v550_v47 = vpop.f32.mrb[25].mxu1 }
 0x205   :  { %666 = vst [vmem:[%s1336_s5 + $0xa8] sm:$0xff] %v634_v51  ;;  %v551_v48 = vadd.f32 %v1169_v34, %v550_v47  ;;  %v838_v57 = vpop.f32.mrb[26].mxu1 }
 0x206   :  { %v607_v58 = vmax.f32 %v559_v43, 0.0  ;;  %v562_v61 = vadd.f32 %v838_v57, %v1169_v34  ;;  %v553_v25 = vpop.f32.mrb[27].mxu1 }
 0x207   :  { %v605_v44 = vmax.f32 %v551_v48, 0.0  ;;  %v554_v29 = vadd.f32 %v1169_v34, %v553_v25 }
 0x208   :  { %v639_v30 = vadd.f32 %v607_v58, %v1090_v53  ;;  %v608_v62 = vmax.f32 %v562_v61, 0.0 }
 0x209   :  { %v637_v63 = vadd.f32 %v605_v44, %v1076_v49  ;;  %v606_v1 = vmax.f32 %v554_v29, 0.0 }
 0x20a   :  { %671 = vst [vmem:[%s1336_s5 + $0xd0] sm:$0xff] %v639_v30  ;;  %v640_v2 = vadd.f32 %v608_v62, %v1095_v54 }
 0x20b   :  { %669 = vst [vmem:[%s1336_s5 + $0xc0] sm:$0xff] %v637_v63  ;;  %v638_v26 = vadd.f32 %v606_v1, %v1081_v50  ;;  %v841_v3 = vpop.f32.mrb[28].mxu1 }
 0x20c   :  { %672 = vst [vmem:[%s1336_s5 + $0xd8] sm:$0xff] %v640_v2  ;;  %v575_v49 = vadd.f32 %v841_v3, %v1169_v34  ;;  %v566_v53 = vpop.f32.mrb[29].mxu1 }
 0x20d   :  { %670 = vst [vmem:[%s1336_s5 + $0xc8] sm:$0xff] %v638_v26  ;;  %v567_v54 = vadd.f32 %v1169_v34, %v566_v53  ;;  %v842_v6 = vpop.f32.mrb[30].mxu1 }
 0x20e   :  { %v611_v7 = vmax.f32 %v575_v49, 0.0  ;;  %v578_v4 = vadd.f32 %v842_v6, %v1169_v34  ;;  %v569_v14 = vpop.f32.mrb[31].mxu1 }
 0x20f   :  { %v609_v50 = vmax.f32 %v567_v54, 0.0  ;;  %v570_v15 = vadd.f32 %v1169_v34, %v569_v14 }
 0x210   :  { %v643_v8 = vadd.f32 %v611_v7, %v1114_v59  ;;  %v612_v9 = vmax.f32 %v578_v4, 0.0 }
 0x211   :  { %v641_v31 = vadd.f32 %v609_v50, %v1100_v55  ;;  %v610_v35 = vmax.f32 %v570_v15, 0.0 }
 0x212   :  { %675 = vst [vmem:[%s1336_s5 + $0xf0] sm:$0xff] %v643_v8  ;;  %v644_v36 = vadd.f32 %v612_v9, %v1119_v60 }
 0x213   :  { %673 = vst [vmem:[%s1336_s5 + $0xe0] sm:$0xff] %v641_v31  ;;  %v642_v10 = vadd.f32 %v610_v35, %v1105_v56 }
 0x214   :  { %676 = vst [vmem:[%s1336_s5 + $0xf8] sm:$0xff] %v644_v36 }
 0x215   :  { %674 = vst [vmem:[%s1336_s5 + $0xe8] sm:$0xff] %v642_v10 }

</bundles_post_ra>
